<compile_context>
chip_gen: v7x
topology: tpu7x:2x2x1
jax: 0.10.0
libtpu: 0.0.40
codegen_flags: <defaults>
</compile_context>

<pallas_src>
import numpy as np
import jax
import jax.numpy as jnp
from jax.experimental import pallas as pl
from jax.experimental.pallas import tpu as pltpu

# ----------------------------- configuration --------------------------------
BATCH = 2
IN_CHANNELS = 4            # must be even
HALF = IN_CHANNELS // 2
HIDDEN = 32
KERNEL_SIZE = 3
DILATION_RATE = 2
NUM_LAYERS = 3
SEQ_LEN = 64
BT = BATCH * SEQ_LEN       # batch folded into the lane/time axis -> 128 lanes
P_DROPOUT = 0.0            # dropout is identity at inference

KH = KERNEL_SIZE * HIDDEN  # fused dilated-conv contraction depth (96)
KH_PAD = 128               # padded to a full vreg / 128-deep MXU

# --- f32 lane-dense slab (width BT): x, mask, tap-boundary masks, end-conv weight ---
ROW_X = 0
ROW_M = ROW_X + IN_CHANNELS          # 4
ROW_TAP = ROW_M + 1                  # 5  (2 rows per layer: [k=0 tap, k=2 tap])
ROW_ENDW = 16                        # 8-aligned block for the f32 end-conv weight
XM_ROWS = ROW_ENDW + IN_CHANNELS     # 20

# --- f32 column slab (width 1): start-conv weight columns + all biases ---
PB_SW = 0                                   # HALF blocks of HIDDEN rows
PB_SB = PB_SW + HALF * HIDDEN               # 64
PB_IB = PB_SB + HIDDEN                      # 96
PB_RB = PB_IB + NUM_LAYERS * 2 * HIDDEN     # 288
PB_EB = PB_RB + NUM_LAYERS * 2 * HIDDEN     # 480
PB_ROWS = PB_EB + IN_CHANNELS               # 484

# --- bf16 weight slab (width KH_PAD): fused dilated-conv weights + res/skip 1x1 ---
W_IN = 0                                    # NUM_LAYERS blocks of (2H, KH_PAD)
W_RS = W_IN + NUM_LAYERS * 2 * HIDDEN       # 192 ; blocks use lanes [0:HIDDEN]
W_ROWS = W_RS + NUM_LAYERS * 2 * HIDDEN     # 384


def _shift_lanes(x, off):
    """result[:, t] = x[:, (t + off) % BT]   (static off; lowers to a lane rotate)."""
    off = off % BT
    if off == 0:
        return x
    return jnp.concatenate([x[:, off:], x[:, :off]], axis=1)


# ------------------------------- the kernel ---------------------------------
def coupling_kernel(xm_ref, pb_ref, w_ref, out_ref):
    f32 = jnp.float32
    bf16 = jnp.bfloat16
    H = HIDDEN

    x0 = xm_ref[ROW_X:ROW_X + HALF, :]                       # (HALF, BT)
    x1 = xm_ref[ROW_X + HALF:ROW_X + IN_CHANNELS, :]         # (HALF, BT)
    m = xm_ref[ROW_M:ROW_M + 1, :]                           # (1, BT)
    m_full = jnp.broadcast_to(m, (H, BT))                    # hoisted, reused everywhere

    # start 1x1 conv on the VPU (contraction depth HALF == 2; MXU would be ~1% full)
    h = pb_ref[PB_SW:PB_SW + H, :] * x0[0:1, :]
    for c in range(1, HALF):
        h = h + pb_ref[PB_SW + c * H:PB_SW + (c + 1) * H, :] * x0[c:c + 1, :]
    h = (h + pb_ref[PB_SB:PB_SB + H, :]) * m_full             # (HIDDEN, BT) f32

    out_acc = jnp.zeros((H, BT), f32)
    zpad = jnp.zeros((KH_PAD - KH, BT), bf16)                  # contraction pad rows
    for i in range(NUM_LAYERS):
        d = DILATION_RATE ** i
        # dilated conv: 3 lane-shifted copies of h, each zeroed at sequence / batch
        # boundaries by a precomputed mask row, fused into one MXU matmul (depth 128).
        mneg = xm_ref[ROW_TAP + 2 * i:ROW_TAP + 2 * i + 1, :]      # valid(t-d)
        mpos = xm_ref[ROW_TAP + 2 * i + 1:ROW_TAP + 2 * i + 2, :]  # valid(t+d)
        tap_l = (_shift_lanes(h, -d) * mneg).astype(bf16)          # k=0 : h[t-d]
        tap_c = h.astype(bf16)                                     # k=1 : h[t]
        tap_r = (_shift_lanes(h, d) * mpos).astype(bf16)           # k=2 : h[t+d]
        stacked = jnp.concatenate([tap_l, tap_c, tap_r, zpad], axis=0)   # (128, BT) bf16

        iw = w_ref[W_IN + 2 * H * i:W_IN + 2 * H * (i + 1), :]           # (2H, 128) bf16
        ib = pb_ref[PB_IB + 2 * H * i:PB_IB + 2 * H * (i + 1), :]        # (2H, 1)   f32
        y = jnp.dot(iw, stacked, preferred_element_type=f32) + ib        # (2H, BT)  f32

        # gated activation; sigmoid(b) == 0.5*(1+tanh(0.5*b))  (single EUP op)
        act = jnp.tanh(y[:H, :]) * (0.5 * (1.0 + jnp.tanh(0.5 * y[H:, :])))

        rw = w_ref[W_RS + 2 * H * i:W_RS + 2 * H * (i + 1), 0:H]         # (2H, H) bf16
        rb = pb_ref[PB_RB + 2 * H * i:PB_RB + 2 * H * (i + 1), :]        # (2H, 1) f32
        rs = jnp.dot(rw, act.astype(bf16), preferred_element_type=f32) + rb

        if i < NUM_LAYERS - 1:
            h = (h + rs[:H, :]) * m_full
            out_acc = out_acc + rs[H:, :]
        else:
            out_acc = out_acc + rs[:H, :]
    out_acc = out_acc * m_full

    # end 1x1 conv kept in f32 (it feeds exp()/logdet; depth 32 and latency-bound anyway)
    ew = xm_ref[ROW_ENDW:ROW_ENDW + IN_CHANNELS, 0:H]                    # (C, H) f32
    eb = pb_ref[PB_EB:PB_EB + IN_CHANNELS, :]                            # (C, 1) f32
    trans = jnp.dot(ew, out_acc, preferred_element_type=f32) + eb        # (C, BT)
    log_s = trans[:HALF, :]
    shift = trans[HALF:, :]

    z1 = (jnp.exp(log_s) * x1 + shift) * m
    ls = log_s * m

    # single merged lane-dense output: [x0 ; z1 ; per-lane logdet row]
    out_ref[0:HALF, :] = x0
    out_ref[HALF:IN_CHANNELS, :] = z1
    out_ref[IN_CHANNELS:IN_CHANNELS + 1, :] = jnp.sum(ls, axis=0, keepdims=True)


# ------------------------------ param packing --------------------------------
def pack_params(start_w, start_b, in_w, in_b, rs_w, rs_b, end_w, end_b):
    # (a) f32 column slab (width 1): start-conv weight columns + all biases
    pb = np.zeros((PB_ROWS, 1), np.float32)
    sw = np.asarray(start_w, np.float32)
    for c in range(HALF):
        pb[PB_SW + c * HIDDEN:PB_SW + (c + 1) * HIDDEN, 0] = sw[:, c]
    pb[PB_SB:PB_SB + HIDDEN, 0] = np.asarray(start_b, np.float32)[:, 0]
    for l in range(NUM_LAYERS):
        pb[PB_IB + 2 * HIDDEN * l:PB_IB + 2 * HIDDEN * (l + 1), 0] = np.asarray(in_b)[l, :, 0]
        pb[PB_RB + 2 * HIDDEN * l:PB_RB + 2 * HIDDEN * (l + 1), 0] = np.asarray(rs_b)[l, :, 0]
    pb[PB_EB:PB_EB + IN_CHANNELS, 0] = np.asarray(end_b, np.float32)[:, 0]

    # (b) bf16 weight slab: fused K-tap conv weights (contraction padded 96->128) + res/skip
    w = np.zeros((W_ROWS, KH_PAD), np.float32)
    # fused[l, o, k*H + c] == in_w[l, o, c, k]  (tap-major, matching the stacked activations)
    fused = np.transpose(np.asarray(in_w, np.float32), (0, 1, 3, 2)).reshape(
        NUM_LAYERS, 2 * HIDDEN, KH)
    for l in range(NUM_LAYERS):
        w[W_IN + 2 * HIDDEN * l:W_IN + 2 * HIDDEN * (l + 1), :KH] = fused[l]
        w[W_RS + 2 * HIDDEN * l:W_RS + 2 * HIDDEN * (l + 1), :HIDDEN] = np.asarray(rs_w)[l]
    w_slab = jnp.asarray(w).astype(jnp.bfloat16)

    # (c) constant rows of the lane-dense f32 slab: tap boundary masks + f32 end-conv weight
    const = np.zeros((XM_ROWS - ROW_TAP, BT), np.float32)
    pos = np.tile(np.arange(SEQ_LEN), BATCH)          # within-sequence position of each lane
    for l in range(NUM_LAYERS):
        d = DILATION_RATE ** l
        const[2 * l, :] = (pos - d >= 0).astype(np.float32)            # tap k=0 : h[t-d]
        const[2 * l + 1, :] = (pos + d < SEQ_LEN).astype(np.float32)   # tap k=2 : h[t+d]
    const[ROW_ENDW - ROW_TAP:ROW_ENDW - ROW_TAP + IN_CHANNELS, :HIDDEN] = \
        np.asarray(end_w, np.float32)

    return jnp.asarray(pb), w_slab, jnp.asarray(const)


# ------------------------------- the wrapper ---------------------------------
@jax.jit
def coupling_block_forward(seq, mask, packed_params):
    pb_slab, w_slab, const_rows = packed_params

    # fold the batch into the lane/time axis: (B, C, T) -> (C, B*T)  (layout plumbing only)
    x_flat = jnp.transpose(seq, (1, 0, 2)).reshape(IN_CHANNELS, BT)
    m_flat = jnp.transpose(mask, (1, 0, 2)).reshape(1, BT)
    xm_slab = jnp.concatenate([x_flat, m_flat, const_rows], axis=0)     # (XM_ROWS, BT) f32

    out = pl.pallas_call(
        coupling_kernel,
        out_shape=jax.ShapeDtypeStruct((IN_CHANNELS + 1, BT), jnp.float32),
        in_specs=[pl.BlockSpec(memory_space=pltpu.MemorySpace.VMEM)] * 3,
        out_specs=pl.BlockSpec(memory_space=pltpu.MemorySpace.VMEM),
    )(xm_slab, pb_slab, w_slab)

    z = jnp.transpose(out[:IN_CHANNELS].reshape(IN_CHANNELS, BATCH, SEQ_LEN), (1, 0, 2))
    logdet = out[IN_CHANNELS].reshape(BATCH, SEQ_LEN).sum(axis=1)       # 2 tiny fused sums
    return z, logdet


# ----------------------------- pure-JAX reference ----------------------------
def reference(seq, mask, start_w, start_b, in_w, in_b, rs_w, rs_b, end_w, end_b):
    x0 = seq[:, :HALF, :]
    x1 = seq[:, HALF:, :]
    h = jnp.einsum("oc,bct->bot", start_w, x0) + start_b[None]
    h = h * mask
    out = jnp.zeros((BATCH, HIDDEN, SEQ_LEN), jnp.float32)
    for i in range(NUM_LAYERS):
        d = DILATION_RATE ** i
        pad = (KERNEL_SIZE * d - d) // 2
        y = jax.lax.conv_general_dilated(
            h, in_w[i], window_strides=(1,), padding=[(pad, pad)],
            rhs_dilation=(d,), dimension_numbers=("NCH", "OIH", "NCH")) + in_b[i][None]
        act = jnp.tanh(y[:, :HIDDEN]) * jax.nn.sigmoid(y[:, HIDDEN:])
        rs = jnp.einsum("oc,bct->bot", rs_w[i], act) + rs_b[i][None]
        if i < NUM_LAYERS - 1:
            h = (h + rs[:, :HIDDEN]) * mask
            out = out + rs[:, HIDDEN:]
        else:
            out = out + rs[:, :HIDDEN]
    out = out * mask
    trans = jnp.einsum("oc,bct->bot", end_w, out) + end_b[None]
    log_s = trans[:, :HALF]
    shift = trans[:, HALF:]
    z1 = (jnp.exp(log_s) * x1 + shift) * mask
    z = jnp.concatenate([x0, z1], axis=1)
    logdet = jnp.sum(log_s * mask, axis=(1, 2))
    return z, logdet


# ----------------------------------- main ------------------------------------
if __name__ == "__main__":
    key = jax.random.PRNGKey(0)
    ks = jax.random.split(key, 10)
    scale = 0.1

    # deterministic synthetic parameters (weight-norm folded into plain weights), f32 masters
    start_w = jax.random.normal(ks[0], (HIDDEN, HALF), jnp.float32) * scale
    start_b = jax.random.normal(ks[1], (HIDDEN, 1), jnp.float32) * scale
    in_w = jax.random.normal(ks[2], (NUM_LAYERS, 2 * HIDDEN, HIDDEN, KERNEL_SIZE), jnp.float32) * scale
    in_b = jax.random.normal(ks[3], (NUM_LAYERS, 2 * HIDDEN, 1), jnp.float32) * scale
    rs_w = jax.random.normal(ks[4], (NUM_LAYERS, 2 * HIDDEN, HIDDEN), jnp.float32) * scale
    rs_b = jax.random.normal(ks[5], (NUM_LAYERS, 2 * HIDDEN, 1), jnp.float32) * scale
    end_w = jax.random.normal(ks[6], (IN_CHANNELS, HIDDEN), jnp.float32) * scale
    end_b = jax.random.normal(ks[7], (IN_CHANNELS, 1), jnp.float32) * scale

    packed = pack_params(start_w, start_b, in_w, in_b, rs_w, rs_b, end_w, end_b)

    # deterministic inputs (batch 1 is shorter than SEQ_LEN to exercise the mask)
    seq = jax.random.normal(ks[8], (BATCH, IN_CHANNELS, SEQ_LEN), jnp.float32)
    lengths = jnp.array([SEQ_LEN, SEQ_LEN - 16], jnp.int32)
    mask = (jnp.arange(SEQ_LEN)[None, :] < lengths[:, None]).astype(jnp.float32)[:, None, :]

    z, logdet = coupling_block_forward(seq, mask, packed)
    jax.block_until_ready((z, logdet))

    z_exp, logdet_exp = reference(seq, mask, start_w, start_b, in_w, in_b,
                                  rs_w, rs_b, end_w, end_b)

    # bf16 matmul operands (f32 accumulation, f32 end conv) -> modest tolerances
    np.testing.assert_allclose(np.asarray(z), np.asarray(z_exp), rtol=2e-2, atol=2e-2)
    np.testing.assert_allclose(np.asarray(logdet), np.asarray(logdet_exp), rtol=5e-2, atol=8e-2)
    print("KERNEL_OK")
</pallas_src>

<mosaic_0001>
module attributes {stable_mosaic.version = 11 : i64} {
  func.func @coupling_kernel(%arg0: memref<20x128xf32, #tpu.memory_space<vmem>>, %arg1: memref<484x1xf32, #tpu.memory_space<vmem>>, %arg2: memref<384x128xbf16, #tpu.memory_space<vmem>>, %arg3: memref<5x128xf32, #tpu.memory_space<vmem>>) attributes {dimension_semantics = [], scalar_prefetch = 0 : i64, scratch_operands = 0 : i64, tpu.core_type = #tpu.core_type<tc>} {
    %c0 = arith.constant 0 : index
    %c0_0 = arith.constant 0 : index
    %0 = vector.load %arg0[%c0, %c0_0] : memref<20x128xf32, #tpu.memory_space<vmem>>, vector<2x128xf32>
    %c2 = arith.constant 2 : index
    %c0_1 = arith.constant 0 : index
    %1 = vector.load %arg0[%c2, %c0_1] : memref<20x128xf32, #tpu.memory_space<vmem>>, vector<2x128xf32>
    %c4 = arith.constant 4 : index
    %c0_2 = arith.constant 0 : index
    %2 = vector.load %arg0[%c4, %c0_2] : memref<20x128xf32, #tpu.memory_space<vmem>>, vector<1x128xf32>
    %3 = vector.shape_cast %2 : vector<1x128xf32> to vector<1x128xf32>
    %4 = vector.broadcast %3 : vector<1x128xf32> to vector<32x128xf32>
    %c0_3 = arith.constant 0 : index
    %c0_4 = arith.constant 0 : index
    %5 = vector.load %arg1[%c0_3, %c0_4] : memref<484x1xf32, #tpu.memory_space<vmem>>, vector<32x1xf32>
    %6 = vector.extract_strided_slice %0 {offsets = [0, 0], sizes = [1, 128], strides = [1, 1]} : vector<2x128xf32> to vector<1x128xf32>
    %7 = vector.broadcast %5 : vector<32x1xf32> to vector<32x128xf32>
    %8 = vector.broadcast %6 : vector<1x128xf32> to vector<32x128xf32>
    %9 = arith.mulf %7, %8 : vector<32x128xf32>
    %c32 = arith.constant 32 : index
    %c0_5 = arith.constant 0 : index
    %10 = vector.load %arg1[%c32, %c0_5] : memref<484x1xf32, #tpu.memory_space<vmem>>, vector<32x1xf32>
    %11 = vector.extract_strided_slice %0 {offsets = [1, 0], sizes = [1, 128], strides = [1, 1]} : vector<2x128xf32> to vector<1x128xf32>
    %12 = vector.broadcast %10 : vector<32x1xf32> to vector<32x128xf32>
    %13 = vector.broadcast %11 : vector<1x128xf32> to vector<32x128xf32>
    %14 = arith.mulf %12, %13 : vector<32x128xf32>
    %15 = arith.addf %9, %14 : vector<32x128xf32>
    %c64 = arith.constant 64 : index
    %c0_6 = arith.constant 0 : index
    %16 = vector.load %arg1[%c64, %c0_6] : memref<484x1xf32, #tpu.memory_space<vmem>>, vector<32x1xf32>
    %17 = vector.broadcast %16 : vector<32x1xf32> to vector<32x128xf32>
    %18 = arith.addf %15, %17 : vector<32x128xf32>
    %19 = arith.mulf %18, %4 : vector<32x128xf32>
    %cst = arith.constant 0.000000e+00 : f32
    %20 = vector.broadcast %cst : f32 to vector<32x128xf32>
    %cst_7 = arith.constant 0.000000e+00 : bf16
    %21 = vector.broadcast %cst_7 : bf16 to vector<32x128xbf16>
    %c5 = arith.constant 5 : index
    %c0_8 = arith.constant 0 : index
    %22 = vector.load %arg0[%c5, %c0_8] : memref<20x128xf32, #tpu.memory_space<vmem>>, vector<1x128xf32>
    %c6 = arith.constant 6 : index
    %c0_9 = arith.constant 0 : index
    %23 = vector.load %arg0[%c6, %c0_9] : memref<20x128xf32, #tpu.memory_space<vmem>>, vector<1x128xf32>
    %24 = vector.extract_strided_slice %19 {offsets = [0, 127], sizes = [32, 1], strides = [1, 1]} : vector<32x128xf32> to vector<32x1xf32>
    %25 = vector.extract_strided_slice %19 {offsets = [0, 0], sizes = [32, 127], strides = [1, 1]} : vector<32x128xf32> to vector<32x127xf32>
    %26 = tpu.concatenate %24, %25 in 1 : vector<32x1xf32>, vector<32x127xf32> -> vector<32x128xf32>
    %27 = vector.broadcast %22 : vector<1x128xf32> to vector<32x128xf32>
    %28 = arith.mulf %26, %27 : vector<32x128xf32>
    %29 = arith.truncf %28 : vector<32x128xf32> to vector<32x128xbf16>
    %30 = arith.truncf %19 : vector<32x128xf32> to vector<32x128xbf16>
    %31 = vector.extract_strided_slice %19 {offsets = [0, 1], sizes = [32, 127], strides = [1, 1]} : vector<32x128xf32> to vector<32x127xf32>
    %32 = vector.extract_strided_slice %19 {offsets = [0, 0], sizes = [32, 1], strides = [1, 1]} : vector<32x128xf32> to vector<32x1xf32>
    %33 = tpu.concatenate %31, %32 in 1 : vector<32x127xf32>, vector<32x1xf32> -> vector<32x128xf32>
    %34 = vector.broadcast %23 : vector<1x128xf32> to vector<32x128xf32>
    %35 = arith.mulf %33, %34 : vector<32x128xf32>
    %36 = arith.truncf %35 : vector<32x128xf32> to vector<32x128xbf16>
    %37 = tpu.concatenate %29, %30, %36, %21 in 0 : vector<32x128xbf16>, vector<32x128xbf16>, vector<32x128xbf16>, vector<32x128xbf16> -> vector<128x128xbf16>
    %c0_10 = arith.constant 0 : index
    %c0_11 = arith.constant 0 : index
    %38 = vector.load %arg2[%c0_10, %c0_11] : memref<384x128xbf16, #tpu.memory_space<vmem>>, vector<64x128xbf16>
    %c96 = arith.constant 96 : index
    %c0_12 = arith.constant 0 : index
    %39 = vector.load %arg1[%c96, %c0_12] : memref<484x1xf32, #tpu.memory_space<vmem>>, vector<64x1xf32>
    %cst_13 = arith.constant dense<0.000000e+00> : vector<64x128xf32>
    %40 = tpu.matmul %38, %37, %cst_13 {dimension_numbers = #tpu.dot_dimension_numbers<[1], [0], [0], [1], [0, 0, 1, 1], [], []>} : vector<64x128xbf16>, vector<128x128xbf16>, vector<64x128xf32> -> vector<64x128xf32>
    %41 = vector.broadcast %39 : vector<64x1xf32> to vector<64x128xf32>
    %42 = arith.addf %40, %41 : vector<64x128xf32>
    %43 = vector.extract_strided_slice %42 {offsets = [0, 0], sizes = [32, 128], strides = [1, 1]} : vector<64x128xf32> to vector<32x128xf32>
    %44 = math.tanh %43 : vector<32x128xf32>
    %45 = vector.extract_strided_slice %42 {offsets = [32, 0], sizes = [32, 128], strides = [1, 1]} : vector<64x128xf32> to vector<32x128xf32>
    %cst_14 = arith.constant 5.000000e-01 : f32
    %46 = vector.broadcast %cst_14 : f32 to vector<32x128xf32>
    %47 = arith.mulf %46, %45 : vector<32x128xf32>
    %48 = math.tanh %47 : vector<32x128xf32>
    %cst_15 = arith.constant 1.000000e+00 : f32
    %49 = vector.broadcast %cst_15 : f32 to vector<32x128xf32>
    %50 = arith.addf %49, %48 : vector<32x128xf32>
    %cst_16 = arith.constant 5.000000e-01 : f32
    %51 = vector.broadcast %cst_16 : f32 to vector<32x128xf32>
    %52 = arith.mulf %51, %50 : vector<32x128xf32>
    %53 = arith.mulf %44, %52 : vector<32x128xf32>
    %c192 = arith.constant 192 : index
    %c0_17 = arith.constant 0 : index
    %54 = vector.load %arg2[%c192, %c0_17] : memref<384x128xbf16, #tpu.memory_space<vmem>>, vector<64x32xbf16>
    %c288 = arith.constant 288 : index
    %c0_18 = arith.constant 0 : index
    %55 = vector.load %arg1[%c288, %c0_18] : memref<484x1xf32, #tpu.memory_space<vmem>>, vector<64x1xf32>
    %56 = arith.truncf %53 : vector<32x128xf32> to vector<32x128xbf16>
    %cst_19 = arith.constant dense<0.000000e+00> : vector<64x128xf32>
    %57 = tpu.matmul %54, %56, %cst_19 {dimension_numbers = #tpu.dot_dimension_numbers<[1], [0], [0], [1], [0, 0, 1, 1], [], []>} : vector<64x32xbf16>, vector<32x128xbf16>, vector<64x128xf32> -> vector<64x128xf32>
    %58 = vector.broadcast %55 : vector<64x1xf32> to vector<64x128xf32>
    %59 = arith.addf %57, %58 : vector<64x128xf32>
    %60 = vector.extract_strided_slice %59 {offsets = [0, 0], sizes = [32, 128], strides = [1, 1]} : vector<64x128xf32> to vector<32x128xf32>
    %61 = arith.addf %19, %60 : vector<32x128xf32>
    %62 = arith.mulf %61, %4 : vector<32x128xf32>
    %63 = vector.extract_strided_slice %59 {offsets = [32, 0], sizes = [32, 128], strides = [1, 1]} : vector<64x128xf32> to vector<32x128xf32>
    %64 = arith.addf %20, %63 : vector<32x128xf32>
    %c7 = arith.constant 7 : index
    %c0_20 = arith.constant 0 : index
    %65 = vector.load %arg0[%c7, %c0_20] : memref<20x128xf32, #tpu.memory_space<vmem>>, vector<1x128xf32>
    %c8 = arith.constant 8 : index
    %c0_21 = arith.constant 0 : index
    %66 = vector.load %arg0[%c8, %c0_21] : memref<20x128xf32, #tpu.memory_space<vmem>>, vector<1x128xf32>
    %67 = vector.extract_strided_slice %62 {offsets = [0, 126], sizes = [32, 2], strides = [1, 1]} : vector<32x128xf32> to vector<32x2xf32>
    %68 = vector.extract_strided_slice %62 {offsets = [0, 0], sizes = [32, 126], strides = [1, 1]} : vector<32x128xf32> to vector<32x126xf32>
    %69 = tpu.concatenate %67, %68 in 1 : vector<32x2xf32>, vector<32x126xf32> -> vector<32x128xf32>
    %70 = vector.broadcast %65 : vector<1x128xf32> to vector<32x128xf32>
    %71 = arith.mulf %69, %70 : vector<32x128xf32>
    %72 = arith.truncf %71 : vector<32x128xf32> to vector<32x128xbf16>
    %73 = arith.truncf %62 : vector<32x128xf32> to vector<32x128xbf16>
    %74 = vector.extract_strided_slice %62 {offsets = [0, 2], sizes = [32, 126], strides = [1, 1]} : vector<32x128xf32> to vector<32x126xf32>
    %75 = vector.extract_strided_slice %62 {offsets = [0, 0], sizes = [32, 2], strides = [1, 1]} : vector<32x128xf32> to vector<32x2xf32>
    %76 = tpu.concatenate %74, %75 in 1 : vector<32x126xf32>, vector<32x2xf32> -> vector<32x128xf32>
    %77 = vector.broadcast %66 : vector<1x128xf32> to vector<32x128xf32>
    %78 = arith.mulf %76, %77 : vector<32x128xf32>
    %79 = arith.truncf %78 : vector<32x128xf32> to vector<32x128xbf16>
    %80 = tpu.concatenate %72, %73, %79, %21 in 0 : vector<32x128xbf16>, vector<32x128xbf16>, vector<32x128xbf16>, vector<32x128xbf16> -> vector<128x128xbf16>
    %c64_22 = arith.constant 64 : index
    %c0_23 = arith.constant 0 : index
    %81 = vector.load %arg2[%c64_22, %c0_23] : memref<384x128xbf16, #tpu.memory_space<vmem>>, vector<64x128xbf16>
    %c160 = arith.constant 160 : index
    %c0_24 = arith.constant 0 : index
    %82 = vector.load %arg1[%c160, %c0_24] : memref<484x1xf32, #tpu.memory_space<vmem>>, vector<64x1xf32>
    %cst_25 = arith.constant dense<0.000000e+00> : vector<64x128xf32>
    %83 = tpu.matmul %81, %80, %cst_25 {dimension_numbers = #tpu.dot_dimension_numbers<[1], [0], [0], [1], [0, 0, 1, 1], [], []>} : vector<64x128xbf16>, vector<128x128xbf16>, vector<64x128xf32> -> vector<64x128xf32>
    %84 = vector.broadcast %82 : vector<64x1xf32> to vector<64x128xf32>
    %85 = arith.addf %83, %84 : vector<64x128xf32>
    %86 = vector.extract_strided_slice %85 {offsets = [0, 0], sizes = [32, 128], strides = [1, 1]} : vector<64x128xf32> to vector<32x128xf32>
    %87 = math.tanh %86 : vector<32x128xf32>
    %88 = vector.extract_strided_slice %85 {offsets = [32, 0], sizes = [32, 128], strides = [1, 1]} : vector<64x128xf32> to vector<32x128xf32>
    %cst_26 = arith.constant 5.000000e-01 : f32
    %89 = vector.broadcast %cst_26 : f32 to vector<32x128xf32>
    %90 = arith.mulf %89, %88 : vector<32x128xf32>
    %91 = math.tanh %90 : vector<32x128xf32>
    %cst_27 = arith.constant 1.000000e+00 : f32
    %92 = vector.broadcast %cst_27 : f32 to vector<32x128xf32>
    %93 = arith.addf %92, %91 : vector<32x128xf32>
    %cst_28 = arith.constant 5.000000e-01 : f32
    %94 = vector.broadcast %cst_28 : f32 to vector<32x128xf32>
    %95 = arith.mulf %94, %93 : vector<32x128xf32>
    %96 = arith.mulf %87, %95 : vector<32x128xf32>
    %c256 = arith.constant 256 : index
    %c0_29 = arith.constant 0 : index
    %97 = vector.load %arg2[%c256, %c0_29] : memref<384x128xbf16, #tpu.memory_space<vmem>>, vector<64x32xbf16>
    %c352 = arith.constant 352 : index
    %c0_30 = arith.constant 0 : index
    %98 = vector.load %arg1[%c352, %c0_30] : memref<484x1xf32, #tpu.memory_space<vmem>>, vector<64x1xf32>
    %99 = arith.truncf %96 : vector<32x128xf32> to vector<32x128xbf16>
    %cst_31 = arith.constant dense<0.000000e+00> : vector<64x128xf32>
    %100 = tpu.matmul %97, %99, %cst_31 {dimension_numbers = #tpu.dot_dimension_numbers<[1], [0], [0], [1], [0, 0, 1, 1], [], []>} : vector<64x32xbf16>, vector<32x128xbf16>, vector<64x128xf32> -> vector<64x128xf32>
    %101 = vector.broadcast %98 : vector<64x1xf32> to vector<64x128xf32>
    %102 = arith.addf %100, %101 : vector<64x128xf32>
    %103 = vector.extract_strided_slice %102 {offsets = [0, 0], sizes = [32, 128], strides = [1, 1]} : vector<64x128xf32> to vector<32x128xf32>
    %104 = arith.addf %62, %103 : vector<32x128xf32>
    %105 = arith.mulf %104, %4 : vector<32x128xf32>
    %106 = vector.extract_strided_slice %102 {offsets = [32, 0], sizes = [32, 128], strides = [1, 1]} : vector<64x128xf32> to vector<32x128xf32>
    %107 = arith.addf %64, %106 : vector<32x128xf32>
    %c9 = arith.constant 9 : index
    %c0_32 = arith.constant 0 : index
    %108 = vector.load %arg0[%c9, %c0_32] : memref<20x128xf32, #tpu.memory_space<vmem>>, vector<1x128xf32>
    %c10 = arith.constant 10 : index
    %c0_33 = arith.constant 0 : index
    %109 = vector.load %arg0[%c10, %c0_33] : memref<20x128xf32, #tpu.memory_space<vmem>>, vector<1x128xf32>
    %110 = vector.extract_strided_slice %105 {offsets = [0, 124], sizes = [32, 4], strides = [1, 1]} : vector<32x128xf32> to vector<32x4xf32>
    %111 = vector.extract_strided_slice %105 {offsets = [0, 0], sizes = [32, 124], strides = [1, 1]} : vector<32x128xf32> to vector<32x124xf32>
    %112 = tpu.concatenate %110, %111 in 1 : vector<32x4xf32>, vector<32x124xf32> -> vector<32x128xf32>
    %113 = vector.broadcast %108 : vector<1x128xf32> to vector<32x128xf32>
    %114 = arith.mulf %112, %113 : vector<32x128xf32>
    %115 = arith.truncf %114 : vector<32x128xf32> to vector<32x128xbf16>
    %116 = arith.truncf %105 : vector<32x128xf32> to vector<32x128xbf16>
    %117 = vector.extract_strided_slice %105 {offsets = [0, 4], sizes = [32, 124], strides = [1, 1]} : vector<32x128xf32> to vector<32x124xf32>
    %118 = vector.extract_strided_slice %105 {offsets = [0, 0], sizes = [32, 4], strides = [1, 1]} : vector<32x128xf32> to vector<32x4xf32>
    %119 = tpu.concatenate %117, %118 in 1 : vector<32x124xf32>, vector<32x4xf32> -> vector<32x128xf32>
    %120 = vector.broadcast %109 : vector<1x128xf32> to vector<32x128xf32>
    %121 = arith.mulf %119, %120 : vector<32x128xf32>
    %122 = arith.truncf %121 : vector<32x128xf32> to vector<32x128xbf16>
    %123 = tpu.concatenate %115, %116, %122, %21 in 0 : vector<32x128xbf16>, vector<32x128xbf16>, vector<32x128xbf16>, vector<32x128xbf16> -> vector<128x128xbf16>
    %c128 = arith.constant 128 : index
    %c0_34 = arith.constant 0 : index
    %124 = vector.load %arg2[%c128, %c0_34] : memref<384x128xbf16, #tpu.memory_space<vmem>>, vector<64x128xbf16>
    %c224 = arith.constant 224 : index
    %c0_35 = arith.constant 0 : index
    %125 = vector.load %arg1[%c224, %c0_35] : memref<484x1xf32, #tpu.memory_space<vmem>>, vector<64x1xf32>
    %cst_36 = arith.constant dense<0.000000e+00> : vector<64x128xf32>
    %126 = tpu.matmul %124, %123, %cst_36 {dimension_numbers = #tpu.dot_dimension_numbers<[1], [0], [0], [1], [0, 0, 1, 1], [], []>} : vector<64x128xbf16>, vector<128x128xbf16>, vector<64x128xf32> -> vector<64x128xf32>
    %127 = vector.broadcast %125 : vector<64x1xf32> to vector<64x128xf32>
    %128 = arith.addf %126, %127 : vector<64x128xf32>
    %129 = vector.extract_strided_slice %128 {offsets = [0, 0], sizes = [32, 128], strides = [1, 1]} : vector<64x128xf32> to vector<32x128xf32>
    %130 = math.tanh %129 : vector<32x128xf32>
    %131 = vector.extract_strided_slice %128 {offsets = [32, 0], sizes = [32, 128], strides = [1, 1]} : vector<64x128xf32> to vector<32x128xf32>
    %cst_37 = arith.constant 5.000000e-01 : f32
    %132 = vector.broadcast %cst_37 : f32 to vector<32x128xf32>
    %133 = arith.mulf %132, %131 : vector<32x128xf32>
    %134 = math.tanh %133 : vector<32x128xf32>
    %cst_38 = arith.constant 1.000000e+00 : f32
    %135 = vector.broadcast %cst_38 : f32 to vector<32x128xf32>
    %136 = arith.addf %135, %134 : vector<32x128xf32>
    %cst_39 = arith.constant 5.000000e-01 : f32
    %137 = vector.broadcast %cst_39 : f32 to vector<32x128xf32>
    %138 = arith.mulf %137, %136 : vector<32x128xf32>
    %139 = arith.mulf %130, %138 : vector<32x128xf32>
    %c320 = arith.constant 320 : index
    %c0_40 = arith.constant 0 : index
    %140 = vector.load %arg2[%c320, %c0_40] : memref<384x128xbf16, #tpu.memory_space<vmem>>, vector<64x32xbf16>
    %c416 = arith.constant 416 : index
    %c0_41 = arith.constant 0 : index
    %141 = vector.load %arg1[%c416, %c0_41] : memref<484x1xf32, #tpu.memory_space<vmem>>, vector<64x1xf32>
    %142 = arith.truncf %139 : vector<32x128xf32> to vector<32x128xbf16>
    %cst_42 = arith.constant dense<0.000000e+00> : vector<64x128xf32>
    %143 = tpu.matmul %140, %142, %cst_42 {dimension_numbers = #tpu.dot_dimension_numbers<[1], [0], [0], [1], [0, 0, 1, 1], [], []>} : vector<64x32xbf16>, vector<32x128xbf16>, vector<64x128xf32> -> vector<64x128xf32>
    %144 = vector.broadcast %141 : vector<64x1xf32> to vector<64x128xf32>
    %145 = arith.addf %143, %144 : vector<64x128xf32>
    %146 = vector.extract_strided_slice %145 {offsets = [0, 0], sizes = [32, 128], strides = [1, 1]} : vector<64x128xf32> to vector<32x128xf32>
    %147 = arith.addf %107, %146 : vector<32x128xf32>
    %148 = arith.mulf %147, %4 : vector<32x128xf32>
    %c16 = arith.constant 16 : index
    %c0_43 = arith.constant 0 : index
    %149 = vector.load %arg0[%c16, %c0_43] : memref<20x128xf32, #tpu.memory_space<vmem>>, vector<4x32xf32>
    %c480 = arith.constant 480 : index
    %c0_44 = arith.constant 0 : index
    %150 = vector.load %arg1[%c480, %c0_44] : memref<484x1xf32, #tpu.memory_space<vmem>>, vector<4x1xf32>
    %cst_45 = arith.constant dense<0.000000e+00> : vector<4x128xf32>
    %151 = tpu.matmul %149, %148, %cst_45 {dimension_numbers = #tpu.dot_dimension_numbers<[1], [0], [0], [1], [0, 0, 1, 1], [], []>} : vector<4x32xf32>, vector<32x128xf32>, vector<4x128xf32> -> vector<4x128xf32>
    %152 = vector.broadcast %150 : vector<4x1xf32> to vector<4x128xf32>
    %153 = arith.addf %151, %152 : vector<4x128xf32>
    %154 = vector.extract_strided_slice %153 {offsets = [0, 0], sizes = [2, 128], strides = [1, 1]} : vector<4x128xf32> to vector<2x128xf32>
    %155 = vector.extract_strided_slice %153 {offsets = [2, 0], sizes = [2, 128], strides = [1, 1]} : vector<4x128xf32> to vector<2x128xf32>
    %156 = math.exp %154 : vector<2x128xf32>
    %157 = arith.mulf %156, %1 : vector<2x128xf32>
    %158 = arith.addf %157, %155 : vector<2x128xf32>
    %159 = vector.broadcast %2 : vector<1x128xf32> to vector<2x128xf32>
    %160 = arith.mulf %158, %159 : vector<2x128xf32>
    %161 = vector.broadcast %2 : vector<1x128xf32> to vector<2x128xf32>
    %162 = arith.mulf %154, %161 : vector<2x128xf32>
    %c0_46 = arith.constant 0 : index
    %c0_47 = arith.constant 0 : index
    %163 = vector.load %arg3[%c0_46, %c0_47] : memref<5x128xf32, #tpu.memory_space<vmem>>, vector<2x128xf32>
    tpu.vector_store %arg3[%c0_46, %c0_47], %0 {strides = array<i32>} : memref<5x128xf32, #tpu.memory_space<vmem>>, vector<2x128xf32>,
    %c2_48 = arith.constant 2 : index
    %c0_49 = arith.constant 0 : index
    %164 = vector.load %arg3[%c2_48, %c0_49] : memref<5x128xf32, #tpu.memory_space<vmem>>, vector<2x128xf32>
    tpu.vector_store %arg3[%c2_48, %c0_49], %160 {strides = array<i32>} : memref<5x128xf32, #tpu.memory_space<vmem>>, vector<2x128xf32>,
    %cst_50 = arith.constant dense<0.000000e+00> : vector<128xf32>
    %165 = vector.multi_reduction <add>, %162, %cst_50 [0] : vector<2x128xf32> to vector<128xf32>
    %166 = vector.shape_cast %165 : vector<128xf32> to vector<1x128xf32>
    %c4_51 = arith.constant 4 : index
    %c0_52 = arith.constant 0 : index
    %167 = vector.load %arg3[%c4_51, %c0_52] : memref<5x128xf32, #tpu.memory_space<vmem>>, vector<1x128xf32>
    tpu.vector_store %arg3[%c4_51, %c0_52], %166 {strides = array<i32>} : memref<5x128xf32, #tpu.memory_space<vmem>>, vector<1x128xf32>,
    return
  }
}

</mosaic_0001>

<bundles_post_ra>
// kernel: squeeze.1
= control target key start
LH: loop header
LB: loop body
LE: loop exit
PB: predicated region body
PF: predicated region fallthrough
CT: control target
= control target key end

     0   :  { %vm7_vm0 = vcmask 523264   ;;  %s39_s0 = inlined_call_operand.vmem [shape: f32[128], index: 0, kind: input, shape index: {}]   ;;  %s40_s1 = inlined_call_operand.vmem [shape: f32[2,64], index: 1, kind: output, shape index: {}]  }
   0x1   :  { %v4_v0 = vld [vmem:[%s39_s0] sm:$0x1]  ;;  %s22_s0 = smov 64  }
   0x2   :  { %5 = vst [vmem:[#allocation1] sm:$0x1] %v4_v0 }
   0x9   :  { %v9_v1 = vld [vmem:[#allocation1] sm:$0x1]  }
   0xa   :  { %v6_v2 = vld [vmem:[#allocation1] sm:$0x1]   ;;  %10 = vrot.lane.b32.xlu0 %v9_v1, %s22_s0 }
   0xb   :  { %8 = vst.msk [vmem:[#allocation0] sm:$0x1] %vm7_vm0, %v6_v2  }
  0x7c   :  { %v11_v3 = vpop.permute.xlu0 %10  }
  0x7d   :  { %14 = vst.msk [vmem:[#allocation0 + $0x1] sm:$0x1] %vm7_vm0, %v11_v3  }
  0x84   :  { %v18_v4 = vld [vmem:[#allocation0] sm:$0x3] }
  0x85   :  { %20 = vst [vmem:[%s40_s1] sm:$0x3] %v18_v4 }

// kernel: coupling_block_forward.1
= control target key start
LH: loop header
LB: loop body
LE: loop exit
PB: predicated region body
PF: predicated region fallthrough
CT: control target
= control target key end

     0   :  { %v1700_v0 = vmov 0   ;;  %v46_v14 = vlaneseq  ;;  %s1701_s15 = smov 1   ;;  %s1702_s16 = smov 127   ;;  %vm421_vm0 = vcmask 261120   ;;  %vm1708_vm1 = vmmov 0   ;;  %s2110_s1 = inlined_call_operand.vmem [shape: f32[484,1], index: 1, kind: input, shape index: {}]   ;;  %s2111_s0 = inlined_call_operand.vmem [shape: f32[20,128], index: 0, kind: input, shape index: {}]   ;;  %s2112_s3 = inlined_call_operand.vmem [shape: f32[5,128], index: 3, kind: output, shape index: {}]   ;;  %s2113_s2 = inlined_call_operand.vmem [shape: bf16[384,128], index: 2, kind: input, shape index: {}]  }
   0x1   :  { %1624 = vset.pattern.permute.xlu1 %v1700_v0  ;;  %1623 = vset.pattern.permute.xlu0 %v1700_v0  ;;  %v54_v1 = vld [vmem:[%s2110_s1 + $0x20] sm:$0xff]  ;;  %v55_v3 = vld [vmem:[%s2110_s1 + $0x28] sm:$0xff]  ;;  %v25_v6 = vld [vmem:[%s2110_s1 + $0x18] sm:$0xff]  ;;  %s1703_s30 = smov 2   ;;  %s1704_s8 = smov 126   ;;  %vm1366_vm2 = vcmask 1041408  }
   0x2   :  { %v22_v2 = vld [vmem:[%s2110_s1] sm:$0xff]  ;;  %60 = vperm.xlu1 %1624, %v54_v1   ;;  %v23_v4 = vld [vmem:[%s2110_s1 + $0x8] sm:$0xff]  ;;  %v24_v7 = vld [vmem:[%s2110_s1 + $0x10] sm:$0xff]  ;;  %v47_v15 = vshrl.u32 %v46_v14, 7  ;;  %s1705_s26 = smov 4   ;;  %s1706_s27 = smov 124  }
   0x3   :  { %28 = vperm.xlu0 %1623, %v22_v2   ;;  %v15_v5 = vld [vmem:[%s2111_s0] sm:$0x3]  ;;  %v57_v8 = vld [vmem:[%s2110_s1 + $0x38] sm:$0xff]  ;;  %v56_v9 = vld [vmem:[%s2110_s1 + $0x30] sm:$0xff] }
   0x4   :  { %1364 = vst [vmem:[%s2112_s3] sm:$0x3] %v15_v5  ;;  %v91_v10 = vld [vmem:[%s2110_s1 + $0x48] sm:$0xff]  ;;  %v90_v11 = vld [vmem:[%s2110_s1 + $0x40] sm:$0xff]  ;;  %v93_v12 = vld [vmem:[%s2110_s1 + $0x58] sm:$0xff]  ;;  %v80_v18 = vsub.s32 1, %v47_v15  ;;  %v48_v19 = vsub.s32 0, %v47_v15 }
   0x5   :  { %v92_v13 = vld [vmem:[%s2110_s1 + $0x50] sm:$0xff]  ;;  %v1775_v37 = vld [vmem:[%s2111_s0 + $0x4] ss:$0 sm:$0xff]  ;;  %v187_v53 = vld [vmem:[%s2110_s1 + $0x88] sm:$0xff] }
   0x6   :  { %65 = vperm.xlu1 %1624, %v55_v3   ;;  %v81_v22 = vrot.slane %v15_v5, %v80_v18  ;;  %v49_v23 = vrot.slane %v15_v5, %v48_v19  ;;  %v186_v54 = vld [vmem:[%s2110_s1 + $0x80] sm:$0xff]  ;;  %v189_v56 = vld [vmem:[%s2110_s1 + $0x98] sm:$0xff]  ;;  %v188_v57 = vld [vmem:[%s2110_s1 + $0x90] sm:$0xff] }
   0x7   :  { %33 = vperm.xlu0 %1623, %v23_v4   ;;  %v1625_v55 = vld [vmem:[%s2113_s2] sm:$0xff]   ;;  %v183_v58 = vld [vmem:[%s2110_s1 + $0x68] sm:$0xff]  ;;  %v185_v60 = vld [vmem:[%s2110_s1 + $0x78] sm:$0xff] }
   0x8   :  { %1488 = vmatprep.mubr.bf16.mxu0 %v1625_v55  ;;  %v182_v59 = vld [vmem:[%s2110_s1 + $0x60] sm:$0xff]  ;;  %v184_v61 = vld [vmem:[%s2110_s1 + $0x70] sm:$0xff]  ;;  %v352_v62 = vld [vmem:[%s2110_s1 + $0x128] sm:$0xff] }
   0x9   :  { %v351_v63 = vld [vmem:[%s2110_s1 + $0x120] sm:$0xff]  ;;  %v354_v0 = vld [vmem:[%s2110_s1 + $0x138] sm:$0xff]  ;;  %v353_v1 = vld [vmem:[%s2110_s1 + $0x130] sm:$0xff] }
   0xa   :  { %43 = vperm.xlu1 %1624, %v25_v6   ;;  %v1380_v2 = vld [vmem:[%s2111_s0 + $0x5] ss:$0 sm:$0xff] }
   0xb   :  { %38 = vperm.xlu0 %1623, %v24_v7  }
   0xe   :  { %75 = vperm.xlu1 %1624, %v57_v8  }
   0xf   :  { %70 = vperm.xlu0 %1623, %v56_v9  }
  0x12   :  { %101 = vperm.xlu1 %1624, %v91_v10  }
  0x13   :  { %96 = vperm.xlu0 %1623, %v90_v11  }
  0x16   :  { %111 = vperm.xlu1 %1624, %v93_v12  }
  0x17   :  { %106 = vperm.xlu0 %1623, %v92_v13  }
  0x81   :  { %v61_v16 = vpop.permute.xlu1 %60 }
  0x82   :  { %v29_v17 = vpop.permute.xlu0 %28  ;;  %v82_v26 = vmul.f32 %v81_v22, %v61_v16  ;;  %v1381_v16 = vld [vmem:[%s2111_s0 + $0x6] ss:$0 sm:$0xff] }
  0x83   :  { %v50_v27 = vmul.f32 %v49_v23, %v29_v17 }
  0x85   :  { %v66_v20 = vpop.permute.xlu1 %65  ;;  %v86_v35 = vadd.f32 %v82_v26, %v50_v27  ;;  %v1626_v26 = vld [vmem:[%s2113_s2 + $0x8] sm:$0xff]   ;;  %v1627_v27 = vld [vmem:[%s2113_s2 + $0x10] sm:$0xff]  }
  0x86   :  { %v34_v21 = vpop.permute.xlu0 %33  ;;  %v83_v28 = vmul.f32 %v81_v22, %v66_v20 }
  0x87   :  { %v51_v29 = vmul.f32 %v49_v23, %v34_v21 }
  0x89   :  { %v44_v24 = vpop.permute.xlu1 %43  ;;  %v87_v34 = vadd.f32 %v83_v28, %v51_v29  ;;  %v1628_v28 = vld [vmem:[%s2113_s2 + $0x18] sm:$0xff]   ;;  %v1629_v29 = vld [vmem:[%s2113_s2 + $0x60] sm:$0xff]  }
  0x8a   :  { %v39_v25 = vpop.permute.xlu0 %38  ;;  %v53_v39 = vmul.f32 %v49_v23, %v44_v24  ;;  %1500 = vmatprep.mubr.msk.bf16.mxu1 %vm421_vm0, %v1629_v29 }
  0x8b   :  { %v52_v40 = vmul.f32 %v49_v23, %v39_v25 }
  0x8d   :  { %v76_v30 = vpop.permute.xlu1 %75 }
  0x8e   :  { %v71_v31 = vpop.permute.xlu0 %70  ;;  %v85_v32 = vmul.f32 %v81_v22, %v76_v30 }
  0x8f   :  { %v84_v33 = vmul.f32 %v81_v22, %v71_v31 }
  0x90   :  { %v89_v45 = vadd.f32 %v85_v32, %v53_v39 }
  0x91   :  { %v102_v36 = vpop.permute.xlu1 %101  ;;  %v88_v46 = vadd.f32 %v84_v33, %v52_v40 }
  0x92   :  { %v97_v38 = vpop.permute.xlu0 %96  ;;  %v115_v41 = vadd.f32 %v102_v36, %v87_v34 }
  0x93   :  { %v114_v42 = vadd.f32 %v97_v38, %v86_v35 }
  0x94   :  { %v1778_v43 = vmul.f32 %v1775_v37, %v115_v41 }
  0x95   :  { %v1781_v44 = vmul.f32 %v1775_v37, %v114_v42  ;;  %v112_v47 = vpop.permute.xlu1 %111 }
  0x96   :  { %v107_v48 = vpop.permute.xlu0 %106  ;;  %v117_v49 = vadd.f32 %v112_v47, %v89_v45  ;;  %130 = vrot.lane.b32.xlu1 %v1778_v43, %s1701_s15 }
  0x97   :  { %v116_v50 = vadd.f32 %v107_v48, %v88_v46  ;;  %128 = vrot.lane.b32.xlu0 %v1781_v44, %s1701_s15  ;;  %v150_v15 = vpack.c.bf16 %v1778_v43, %v1781_v44 }
  0x98   :  { %v1786_v51 = vmul.f32 %v1775_v37, %v117_v49 }
  0x99   :  { %v1789_v52 = vmul.f32 %v1775_v37, %v116_v50 }
  0x9a   :  { %134 = vrot.lane.b32.xlu1 %v1786_v51, %s1701_s15 }
  0x9b   :  { %132 = vrot.lane.b32.xlu0 %v1789_v52, %s1701_s15  ;;  %v151_v19 = vpack.c.bf16 %v1786_v51, %v1789_v52 }
  0x9e   :  { %154 = vrot.lane.b32.xlu1 %v1778_v43, %s1702_s16 }
  0x9f   :  { %152 = vrot.lane.b32.xlu0 %v1781_v44, %s1702_s16 }
  0xa2   :  { %158 = vrot.lane.b32.xlu1 %v1786_v51, %s1702_s16 }
  0xa3   :  { %156 = vrot.lane.b32.xlu0 %v1789_v52, %s1702_s16 }
  0xa6   :  { %217 = vperm.xlu1 %1624, %v187_v53  }
  0xa7   :  { %212 = vperm.xlu0 %1623, %v186_v54  }
  0xaa   :  { %227 = vperm.xlu1 %1624, %v189_v56  }
  0xab   :  { %222 = vperm.xlu0 %1623, %v188_v57  }
  0xae   :  { %197 = vperm.xlu1 %1624, %v183_v58  }
  0xaf   :  { %192 = vperm.xlu0 %1623, %v182_v59  }
  0xb2   :  { %207 = vperm.xlu1 %1624, %v185_v60  }
  0xb3   :  { %202 = vperm.xlu0 %1623, %v184_v61  }
  0xb6   :  { %368 = vperm.xlu1 %1624, %v352_v62  }
  0xb7   :  { %363 = vperm.xlu0 %1623, %v351_v63  }
  0xba   :  { %378 = vperm.xlu1 %1624, %v354_v0  }
  0xbb   :  { %373 = vperm.xlu0 %1623, %v353_v1  }
 0x108   :  { %v131_v3 = vpop.permute.xlu1 %130 }
 0x109   :  { %v129_v4 = vpop.permute.xlu0 %128  ;;  %v145_v5 = vmul.f32 %v1380_v2, %v131_v3 }
 0x10a   :  { %v144_v6 = vmul.f32 %v1380_v2, %v129_v4 }
 0x10c   :  { %v148_v7 = vpack.c.bf16 %v145_v5, %v144_v6  ;;  %v135_v8 = vpop.permute.xlu1 %134 }
 0x10d   :  { %v133_v9 = vpop.permute.xlu0 %132  ;;  %v147_v10 = vmul.f32 %v1380_v2, %v135_v8 }
 0x10e   :  { %v146_v11 = vmul.f32 %v1380_v2, %v133_v9  ;;  %1476 = vmatprep.subr.bf16.mxu0 %v148_v7 }
 0x10f   :  { %1477 = vmatpush3.bf16.msra.mxu0 %v148_v7 }
 0x110   :  { %v149_v12 = vpack.c.bf16 %v147_v10, %v146_v11  ;;  %v155_v13 = vpop.permute.xlu1 %154 }
 0x111   :  { %v153_v14 = vpop.permute.xlu0 %152  ;;  %v169_v17 = vmul.f32 %v1381_v16, %v155_v13 }
 0x112   :  { %1478 = vmatprep.subr.bf16.mxu0 %v149_v12  ;;  %v168_v18 = vmul.f32 %v1381_v16, %v153_v14 }
 0x113   :  { %1479 = vmatpush3.bf16.msra.mxu0 %v149_v12 }
 0x114   :  { %1480 = vmatprep.subr.bf16.mxu0 %v150_v15  ;;  %v159_v20 = vpop.permute.xlu1 %158  ;;  %v172_v22 = vpack.c.bf16 %v169_v17, %v168_v18 }
 0x115   :  { %v157_v21 = vpop.permute.xlu0 %156  ;;  %v171_v23 = vmul.f32 %v1381_v16, %v159_v20 }
 0x116   :  { %v170_v24 = vmul.f32 %v1381_v16, %v157_v21  ;;  %v1630_v21 = vld [vmem:[%s2113_s2 + $0x68] sm:$0xff]  }
 0x117   :  { %1481 = vmatpush3.bf16.msra.mxu0 %v150_v15 }
 0x118   :  { %1482 = vmatprep.subr.bf16.mxu0 %v151_v19  ;;  %v173_v25 = vpack.c.bf16 %v171_v23, %v170_v24 }
 0x11b   :  { %1483 = vmatpush3.bf16.msra.mxu0 %v151_v19 }
 0x11c   :  { %1484 = vmatprep.subr.bf16.mxu0 %v172_v22 }
 0x11f   :  { %1485 = vmatpush3.bf16.msra.mxu0 %v172_v22 }
 0x120   :  { %1486 = vmatprep.subr.bf16.mxu0 %v173_v25 }
 0x123   :  { %1487 = vmatpush3.bf16.msra.mxu0 %v173_v25 }
 0x125   :  { %v218_v31 = vpop.permute.xlu1 %217 }
 0x126   :  { %1489 = vmatmul.mubr.bf16.vlgmr.msra.gmra.mrb[0].mxu0 %v1626_v26  ;;  %v213_v30 = vpop.permute.xlu0 %212 }
 0x127   :  { %1492 = vmatprep.mubr.bf16.mxu0 %v1627_v27 }
 0x129   :  { %v228_v35 = vpop.permute.xlu1 %227 }
 0x12a   :  { %v223_v32 = vpop.permute.xlu0 %222 }
 0x12d   :  { %v198_v40 = vpop.permute.xlu1 %197 }
 0x12e   :  { %1493 = vmatmul.mubr.bf16.gmra.mrb[4].mxu0 %v1628_v28  ;;  %v193_v39 = vpop.permute.xlu0 %192 }
 0x131   :  { %v208_v58 = vpop.permute.xlu1 %207 }
 0x132   :  { %v203_v53 = vpop.permute.xlu0 %202 }
 0x135   :  { %v369_v23 = vpop.permute.xlu1 %368 }
 0x136   :  { %v364_v22 = vpop.permute.xlu0 %363 }
 0x13a   :  { %v374_v25 = vpop.permute.xlu0 %373 }
 0x1f9   :  { %v1490_v33 = vpop.f32.mrb[0].mxu0 }
 0x1fa   :  { %v288_v34 = vpop.f32.mrb[1].mxu0  ;;  %v297_v56 = vadd.f32 %v1490_v33, %v203_v53  ;;  %v574_v53 = vld [vmem:[%s2110_s1 + $0xb8] sm:$0xff] }
 0x1fb   :  { %v1491_v36 = vpop.f32.mrb[2].mxu0  ;;  %v289_v59 = vadd.f32 %v288_v34, %v193_v39 }
 0x1fc   :  { %v291_v38 = vpop.f32.mrb[3].mxu0  ;;  %v300_v61 = vadd.f32 %v1491_v36, %v208_v58  ;;  %v1394_v58 = vld [vmem:[%s2111_s0 + $0x7] ss:$0 sm:$0xff] }
 0x1fd   :  { %v292_v62 = vadd.f32 %v291_v38, %v198_v40 }
 0x201   :  { %v1494_v41 = vpop.f32.mrb[4].mxu0 }
 0x202   :  { %v313_v42 = vadd.f32 %v1494_v41, %v223_v32  ;;  %v304_v45 = vpop.f32.mrb[5].mxu0 }
 0x203   :  { %v305_v46 = vadd.f32 %v304_v45, %v213_v30  ;;  %v1495_v47 = vpop.f32.mrb[6].mxu0  ;;  %v379_v30 = vpop.permute.xlu1 %378  ;;  %v576_v45 = vld [vmem:[%s2110_s1 + $0xc8] sm:$0xff] }
 0x204   :  { %v325_v48 = vmul.f32 0.5, %v313_v42  ;;  %v316_v49 = vadd.f32 %v1495_v47, %v228_v35  ;;  %v307_v50 = vpop.f32.mrb[7].mxu0  ;;  %v1633_v42 = vld [vmem:[%s2113_s2 + $0x20] sm:$0xff]   ;;  %v578_v47 = vld [vmem:[%s2110_s1 + $0xd8] sm:$0xff] }
 0x205   :  { %v323_v54 = vmul.f32 0.5, %v305_v46  ;;  %v308_v55 = vadd.f32 %v307_v50, %v218_v31  ;;  %v577_v46 = vld [vmem:[%s2110_s1 + $0xd0] sm:$0xff] }
 0x206   :  { %1649 = vtanh.f32 %v325_v48  ;;  %v326_v57 = vmul.f32 0.5, %v316_v49  ;;  %v571_v48 = vld [vmem:[%s2110_s1 + $0xa0] sm:$0xff]  ;;  %v572_v49 = vld [vmem:[%s2110_s1 + $0xa8] sm:$0xff]  ;;  %v573_v50 = vld [vmem:[%s2110_s1 + $0xb0] sm:$0xff] }
 0x207   :  { %1651 = vtanh.f32 %v323_v54  ;;  %v324_v60 = vmul.f32 0.5, %v308_v55  ;;  %v740_v54 = vld [vmem:[%s2110_s1 + $0x160] sm:$0xff]  ;;  %v741_v55 = vld [vmem:[%s2110_s1 + $0x168] sm:$0xff] }
 0x208   :  { %1653 = vtanh.f32 %v326_v57  ;;  %v743_v57 = vld [vmem:[%s2110_s1 + $0x178] sm:$0xff] }
 0x209   :  { %1655 = vtanh.f32 %v324_v60 }
 0x20a   :  { %1657 = vtanh.f32 %v297_v56  ;;  %v742_v56 = vld [vmem:[%s2110_s1 + $0x170] sm:$0xff] }
 0x20b   :  { %1659 = vtanh.f32 %v289_v59 }
 0x20c   :  { %1661 = vtanh.f32 %v300_v61 }
 0x20d   :  { %1663 = vtanh.f32 %v292_v62 }
 0x210   :  { %v1650_v63 = vpop.eup %1649 }
 0x211   :  { %v1652_v0 = vpop.eup %1651  ;;  %v333_v1 = vadd.f32 1.0, %v1650_v63 }
 0x212   :  { %v1654_v2 = vpop.eup %1653  ;;  %v331_v3 = vadd.f32 1.0, %v1652_v0 }
 0x213   :  { %v1656_v4 = vpop.eup %1655  ;;  %v337_v5 = vmul.f32 0.5, %v333_v1  ;;  %v334_v6 = vadd.f32 1.0, %v1654_v2 }
 0x214   :  { %v1658_v7 = vpop.eup %1657  ;;  %v335_v8 = vmul.f32 0.5, %v331_v3  ;;  %v332_v9 = vadd.f32 1.0, %v1656_v4 }
 0x215   :  { %v1660_v10 = vpop.eup %1659  ;;  %v338_v11 = vmul.f32 0.5, %v334_v6  ;;  %v341_v12 = vmul.f32 %v1658_v7, %v337_v5 }
 0x216   :  { %v1662_v13 = vpop.eup %1661  ;;  %v336_v14 = vmul.f32 0.5, %v332_v9  ;;  %v339_v15 = vmul.f32 %v1660_v10, %v335_v8  ;;  %v1395_v8 = vld [vmem:[%s2111_s0 + $0x8] ss:$0 sm:$0xff] }
 0x217   :  { %v1664_v16 = vpop.eup %1663  ;;  %v342_v17 = vmul.f32 %v1662_v13, %v338_v11 }
 0x218   :  { %v340_v18 = vmul.f32 %v1664_v16, %v336_v14 }
 0x219   :  { %v360_v19 = vpack.c.bf16 %v342_v17, %v341_v12 }
 0x21a   :  { %v359_v20 = vpack.c.bf16 %v340_v18, %v339_v15  ;;  %v1634_v18 = vld [vmem:[%s2113_s2 + $0x28] sm:$0xff]  }
 0x21c   :  { %1496 = vmatprep.subr.bf16.mxu1 %v359_v20 }
 0x21d   :  { %1497 = vmatpush3.bf16.msra.mxu1 %v359_v20  ;;  %v1636_v20 = vld [vmem:[%s2113_s2 + $0x38] sm:$0xff]  }
 0x21e   :  { %1498 = vmatprep.subr.bf16.mxu1 %v360_v19 }
 0x221   :  { %1499 = vmatpush3.bf16.msra.mxu1 %v360_v19  ;;  %v1635_v19 = vld [vmem:[%s2113_s2 + $0x30] sm:$0xff]  }
 0x224   :  { %1501 = vmatmul.mubr.msk.bf16.vlgmr.msra.gmra.mrb[0].mxu1 %vm421_vm0, %v1630_v21  ;;  %v1637_v21 = vld [vmem:[%s2113_s2 + $0x80] sm:$0xff]  }
 0x2f7   :  { %v1502_v24 = vpop.f32.mrb[0].mxu1 }
 0x2f8   :  { %v468_v26 = vpop.f32.mrb[1].mxu1  ;;  %v477_v27 = vadd.f32 %v1502_v24, %v374_v25 }
 0x2f9   :  { %v469_v28 = vadd.f32 %v468_v26, %v364_v22  ;;  %v1503_v29 = vpop.f32.mrb[2].mxu1 }
 0x2fa   :  { %v471_v31 = vpop.f32.mrb[3].mxu1  ;;  %v480_v33 = vadd.f32 %v1503_v29, %v379_v30  ;;  %v501_v35 = vadd.f32 %v477_v27, %v1789_v52  ;;  %v575_v52 = vld [vmem:[%s2110_s1 + $0xc0] sm:$0xff] }
 0x2fb   :  { %v499_v32 = vadd.f32 %v469_v28, %v1781_v44  ;;  %v472_v34 = vadd.f32 %v471_v31, %v369_v23 }
 0x2fc   :  { %v502_v39 = vadd.f32 %v480_v33, %v1786_v51  ;;  %v1875_v41 = vmul.f32 %v1775_v37, %v501_v35  ;;  %v1632_v51 = vld [vmem:[%s2113_s2 + $0x78] sm:$0xff]  }
 0x2fd   :  { %v1866_v36 = vmul.f32 %v1775_v37, %v499_v32  ;;  %v500_v38 = vadd.f32 %v472_v34, %v1778_v43  ;;  %v1631_v43 = vld [vmem:[%s2113_s2 + $0x70] sm:$0xff]  }
 0x2fe   :  { %v1879_v44 = vmul.f32 %v1775_v37, %v502_v39  ;;  %1504 = vmatprep.mubr.msk.bf16.mxu1 %vm421_vm0, %v1631_v43 }
 0x2ff   :  { %v1871_v40 = vmul.f32 %v1775_v37, %v500_v38  ;;  %517 = vrot.lane.b32.xlu0 %v1866_v36, %s1703_s30  ;;  %1505 = vmatmul.mubr.msk.bf16.gmra.mrb[4].mxu1 %vm421_vm0, %v1632_v51 }
 0x300   :  { %1520 = vmatprep.mubr.bf16.mxu1 %v1633_v42  ;;  %v540_v10 = vpack.c.bf16 %v1879_v44, %v1875_v41 }
 0x301   :  { %519 = vrot.lane.b32.xlu1 %v1871_v40, %s1703_s30  ;;  %v539_v6 = vpack.c.bf16 %v1871_v40, %v1866_v36 }
 0x303   :  { %521 = vrot.lane.b32.xlu0 %v1875_v41, %s1703_s30 }
 0x305   :  { %523 = vrot.lane.b32.xlu1 %v1879_v44, %s1703_s30 }
 0x307   :  { %541 = vrot.lane.b32.xlu0 %v1866_v36, %s1704_s8 }
 0x309   :  { %543 = vrot.lane.b32.xlu1 %v1871_v40, %s1704_s8 }
 0x30b   :  { %545 = vrot.lane.b32.xlu0 %v1875_v41, %s1704_s8 }
 0x30d   :  { %547 = vrot.lane.b32.xlu1 %v1879_v44, %s1704_s8 }
 0x30f   :  { %601 = vperm.xlu0 %1623, %v575_v52  }
 0x311   :  { %606 = vperm.xlu1 %1624, %v576_v45  }
 0x313   :  { %611 = vperm.xlu0 %1623, %v577_v46  }
 0x315   :  { %616 = vperm.xlu1 %1624, %v578_v47  }
 0x317   :  { %581 = vperm.xlu0 %1623, %v571_v48  }
 0x319   :  { %586 = vperm.xlu1 %1624, %v572_v49  }
 0x31b   :  { %591 = vperm.xlu0 %1623, %v573_v50  }
 0x31d   :  { %596 = vperm.xlu1 %1624, %v574_v53  }
 0x31f   :  { %752 = vperm.xlu0 %1623, %v740_v54  }
 0x321   :  { %757 = vperm.xlu1 %1624, %v741_v55  }
 0x323   :  { %762 = vperm.xlu0 %1623, %v742_v56  }
 0x325   :  { %767 = vperm.xlu1 %1624, %v743_v57  }
 0x371   :  { %v518_v59 = vpop.permute.xlu0 %517 }
 0x372   :  { %v533_v61 = vmul.f32 %v1394_v58, %v518_v59 }
 0x373   :  { %v520_v60 = vpop.permute.xlu1 %519 }
 0x374   :  { %v534_v62 = vmul.f32 %v1394_v58, %v520_v60 }
 0x375   :  { %v522_v63 = vpop.permute.xlu0 %521 }
 0x376   :  { %v537_v0 = vpack.c.bf16 %v534_v62, %v533_v61  ;;  %v535_v2 = vmul.f32 %v1394_v58, %v522_v63 }
 0x377   :  { %v524_v1 = vpop.permute.xlu1 %523 }
 0x378   :  { %v536_v3 = vmul.f32 %v1394_v58, %v524_v1  ;;  %1508 = vmatprep.subr.bf16.mxu1 %v537_v0 }
 0x379   :  { %1509 = vmatpush3.bf16.msra.mxu1 %v537_v0  ;;  %v542_v7 = vpop.permute.xlu0 %541 }
 0x37a   :  { %v538_v4 = vpack.c.bf16 %v536_v3, %v535_v2  ;;  %v557_v12 = vmul.f32 %v1395_v8, %v542_v7 }
 0x37b   :  { %v544_v5 = vpop.permute.xlu1 %543 }
 0x37c   :  { %1510 = vmatprep.subr.bf16.mxu1 %v538_v4  ;;  %v558_v9 = vmul.f32 %v1395_v8, %v544_v5 }
 0x37d   :  { %1511 = vmatpush3.bf16.msra.mxu1 %v538_v4  ;;  %v546_v13 = vpop.permute.xlu0 %545 }
 0x37e   :  { %1512 = vmatprep.subr.bf16.mxu1 %v539_v6  ;;  %v561_v14 = vpack.c.bf16 %v558_v9, %v557_v12  ;;  %v559_v16 = vmul.f32 %v1395_v8, %v546_v13  ;;  %v1638_v13 = vld [vmem:[%s2113_s2 + $0x88] sm:$0xff]  }
 0x37f   :  { %v548_v11 = vpop.permute.xlu1 %547 }
 0x380   :  { %v560_v15 = vmul.f32 %v1395_v8, %v548_v11 }
 0x381   :  { %1513 = vmatpush3.bf16.msra.mxu1 %v539_v6 }
 0x382   :  { %1514 = vmatprep.subr.bf16.mxu1 %v540_v10  ;;  %v562_v17 = vpack.c.bf16 %v560_v15, %v559_v16  ;;  %v1640_v15 = vld [vmem:[%s2113_s2 + $0x98] sm:$0xff]  }
 0x385   :  { %1515 = vmatpush3.bf16.msra.mxu1 %v540_v10 }
 0x386   :  { %1516 = vmatprep.subr.bf16.mxu1 %v561_v14 }
 0x389   :  { %1517 = vmatpush3.bf16.msra.mxu1 %v561_v14  ;;  %v1639_v14 = vld [vmem:[%s2113_s2 + $0x90] sm:$0xff]  }
 0x38a   :  { %1518 = vmatprep.subr.bf16.mxu1 %v562_v17 }
 0x38d   :  { %1519 = vmatpush3.bf16.msra.mxu1 %v562_v17 }
 0x38e   :  { %v602_v22 = vpop.permute.xlu0 %601 }
 0x390   :  { %1521 = vmatmul.mubr.bf16.vlgmr.msra.gmra.mrb[8].mxu1 %v1634_v18  ;;  %v607_v23 = vpop.permute.xlu1 %606 }
 0x391   :  { %1524 = vmatprep.mubr.bf16.mxu1 %v1635_v19 }
 0x392   :  { %v612_v24 = vpop.permute.xlu0 %611 }
 0x394   :  { %v617_v27 = vpop.permute.xlu1 %616 }
 0x396   :  { %v582_v30 = vpop.permute.xlu0 %581 }
 0x398   :  { %1525 = vmatmul.mubr.bf16.gmra.mrb[12].mxu1 %v1636_v20  ;;  %v587_v31 = vpop.permute.xlu1 %586 }
 0x399   :  { %1532 = vmatprep.mubr.msk.bf16.mxu1 %vm421_vm0, %v1637_v21 }
 0x39a   :  { %v592_v52 = vpop.permute.xlu0 %591 }
 0x39c   :  { %v597_v48 = vpop.permute.xlu1 %596 }
 0x39e   :  { %v753_v16 = vpop.permute.xlu0 %752 }
 0x3a0   :  { %v758_v17 = vpop.permute.xlu1 %757 }
 0x3a2   :  { %v763_v18 = vpop.permute.xlu0 %762 }
 0x463   :  { %v1522_v25 = vpop.f32.mrb[8].mxu1 }
 0x464   :  { %v677_v26 = vpop.f32.mrb[9].mxu1  ;;  %v686_v46 = vadd.f32 %v1522_v25, %v592_v52  ;;  %v965_v52 = vld [vmem:[%s2110_s1 + $0x110] sm:$0xff] }
 0x465   :  { %v1523_v28 = vpop.f32.mrb[10].mxu1  ;;  %v678_v49 = vadd.f32 %v677_v26, %v582_v30 }
 0x466   :  { %v680_v29 = vpop.f32.mrb[11].mxu1  ;;  %v689_v53 = vadd.f32 %v1523_v28, %v597_v48  ;;  %v962_v48 = vld [vmem:[%s2110_s1 + $0xf8] sm:$0xff] }
 0x467   :  { %v681_v54 = vadd.f32 %v680_v29, %v587_v31 }
 0x46b   :  { %v1526_v32 = vpop.f32.mrb[12].mxu1 }
 0x46c   :  { %v702_v33 = vadd.f32 %v1526_v32, %v612_v24  ;;  %v693_v34 = vpop.f32.mrb[13].mxu1 }
 0x46d   :  { %v694_v35 = vadd.f32 %v693_v34, %v602_v22  ;;  %v1527_v38 = vpop.f32.mrb[14].mxu1  ;;  %v768_v22 = vpop.permute.xlu1 %767 }
 0x46e   :  { %v714_v39 = vmul.f32 0.5, %v702_v33  ;;  %v705_v43 = vadd.f32 %v1527_v38, %v617_v27  ;;  %v696_v51 = vpop.f32.mrb[15].mxu1 }
 0x46f   :  { %v712_v42 = vmul.f32 0.5, %v694_v35  ;;  %v697_v45 = vadd.f32 %v696_v51, %v607_v23  ;;  %v964_v51 = vld [vmem:[%s2110_s1 + $0x108] sm:$0xff] }
 0x470   :  { %1665 = vtanh.f32 %v714_v39  ;;  %v715_v47 = vmul.f32 0.5, %v705_v43  ;;  %v1641_v43 = vld [vmem:[%s2113_s2 + $0x40] sm:$0xff]  }
 0x471   :  { %1667 = vtanh.f32 %v712_v42  ;;  %v713_v50 = vmul.f32 0.5, %v697_v45  ;;  %1552 = vmatprep.mubr.bf16.mxu0 %v1641_v43  ;;  %v966_v42 = vld [vmem:[%s2110_s1 + $0x118] sm:$0xff]  ;;  %v959_v45 = vld [vmem:[%s2110_s1 + $0xe0] sm:$0xff] }
 0x472   :  { %1669 = vtanh.f32 %v715_v47  ;;  %v961_v47 = vld [vmem:[%s2110_s1 + $0xf0] sm:$0xff] }
 0x473   :  { %1671 = vtanh.f32 %v713_v50  ;;  %v356_v50 = vld [vmem:[%s2110_s1 + $0x148] sm:$0xff] }
 0x474   :  { %1673 = vtanh.f32 %v686_v46  ;;  %v960_v46 = vld [vmem:[%s2110_s1 + $0xe8] sm:$0xff] }
 0x475   :  { %1675 = vtanh.f32 %v678_v49  ;;  %v355_v49 = vld [vmem:[%s2110_s1 + $0x140] sm:$0xff] }
 0x476   :  { %1677 = vtanh.f32 %v689_v53  ;;  %v744_v53 = vld [vmem:[%s2110_s1 + $0x180] sm:$0xff] }
 0x477   :  { %1679 = vtanh.f32 %v681_v54  ;;  %v745_v54 = vld [vmem:[%s2110_s1 + $0x188] sm:$0xff] }
 0x47a   :  { %v1666_v55 = vpop.eup %1665 }
 0x47b   :  { %v1668_v56 = vpop.eup %1667  ;;  %v722_v57 = vadd.f32 1.0, %v1666_v55  ;;  %v357_v55 = vld [vmem:[%s2110_s1 + $0x150] sm:$0xff] }
 0x47c   :  { %v1670_v58 = vpop.eup %1669  ;;  %v720_v59 = vadd.f32 1.0, %v1668_v56  ;;  %v358_v56 = vld [vmem:[%s2110_s1 + $0x158] sm:$0xff] }
 0x47d   :  { %v1672_v60 = vpop.eup %1671  ;;  %v726_v61 = vmul.f32 0.5, %v722_v57  ;;  %v723_v62 = vadd.f32 1.0, %v1670_v58  ;;  %v746_v57 = vld [vmem:[%s2110_s1 + $0x190] sm:$0xff]  ;;  %v747_v58 = vld [vmem:[%s2110_s1 + $0x198] sm:$0xff] }
 0x47e   :  { %v1674_v63 = vpop.eup %1673  ;;  %v724_v0 = vmul.f32 0.5, %v720_v59  ;;  %v721_v1 = vadd.f32 1.0, %v1672_v60  ;;  %v1128_v59 = vld [vmem:[%s2110_s1 + $0x1a0] sm:$0xff]  ;;  %v1129_v60 = vld [vmem:[%s2110_s1 + $0x1a8] sm:$0xff] }
 0x47f   :  { %v1676_v2 = vpop.eup %1675  ;;  %v727_v3 = vmul.f32 0.5, %v723_v62  ;;  %v730_v4 = vmul.f32 %v1674_v63, %v726_v61  ;;  %v1130_v61 = vld [vmem:[%s2110_s1 + $0x1b0] sm:$0xff]  ;;  %v1131_v62 = vld [vmem:[%s2110_s1 + $0x1b8] sm:$0xff]  ;;  %v1276_v63 = vld [vmem:[%s2110_s1 + $0x1e0] sm:$0xf] }
 0x480   :  { %v1678_v5 = vpop.eup %1677  ;;  %v725_v6 = vmul.f32 0.5, %v721_v1  ;;  %v728_v7 = vmul.f32 %v1676_v2, %v724_v0  ;;  %v1408_v0 = vld [vmem:[%s2111_s0 + $0x9] ss:$0 sm:$0xff] }
 0x481   :  { %v1680_v8 = vpop.eup %1679  ;;  %v731_v9 = vmul.f32 %v1678_v5, %v727_v3 }
 0x482   :  { %v729_v10 = vmul.f32 %v1680_v8, %v725_v6 }
 0x483   :  { %v749_v11 = vpack.c.bf16 %v731_v9, %v730_v4 }
 0x484   :  { %v748_v12 = vpack.c.bf16 %v729_v10, %v728_v7 }
 0x486   :  { %1528 = vmatprep.subr.bf16.mxu1 %v748_v12 }
 0x487   :  { %1529 = vmatpush3.bf16.msra.mxu1 %v748_v12 }
 0x488   :  { %1530 = vmatprep.subr.bf16.mxu1 %v749_v11 }
 0x48b   :  { %1531 = vmatpush3.bf16.msra.mxu1 %v749_v11 }
 0x48e   :  { %1533 = vmatmul.mubr.msk.bf16.vlgmr.msra.gmra.mrb[16].mxu1 %vm421_vm0, %v1638_v13  ;;  %v1409_v13 = vld [vmem:[%s2111_s0 + $0xa] ss:$0 sm:$0xff] }
 0x48f   :  { %1536 = vmatprep.mubr.msk.bf16.mxu1 %vm421_vm0, %v1639_v14 }
 0x496   :  { %1537 = vmatmul.mubr.msk.bf16.gmra.mrb[4].mxu1 %vm421_vm0, %v1640_v15 }
 0x561   :  { %v1534_v19 = vpop.f32.mrb[16].mxu1 }
 0x562   :  { %v865_v20 = vadd.f32 %v1534_v19, %v763_v18  ;;  %v856_v21 = vpop.f32.mrb[17].mxu1 }
 0x563   :  { %v857_v23 = vadd.f32 %v856_v21, %v753_v16  ;;  %v1535_v24 = vpop.f32.mrb[18].mxu1 }
 0x564   :  { %v889_v25 = vadd.f32 %v865_v20, %v1875_v41  ;;  %v868_v26 = vadd.f32 %v1535_v24, %v768_v22  ;;  %v859_v27 = vpop.f32.mrb[19].mxu1  ;;  %v1642_v22 = vld [vmem:[%s2113_s2 + $0x48] sm:$0xff]   ;;  %v1644_v24 = vld [vmem:[%s2113_s2 + $0x58] sm:$0xff]  }
 0x565   :  { %v887_v28 = vadd.f32 %v857_v23, %v1866_v36  ;;  %v860_v29 = vadd.f32 %v859_v27, %v758_v17  ;;  %v1643_v23 = vld [vmem:[%s2113_s2 + $0x50] sm:$0xff]  }
 0x566   :  { %v890_v30 = vadd.f32 %v868_v26, %v1879_v44  ;;  %v893_v33 = vmul.f32 %v1775_v37, %v889_v25  ;;  %v1645_v25 = vld [vmem:[%s2113_s2 + $0xa0] sm:$0xff]  }
 0x567   :  { %v888_v31 = vadd.f32 %v860_v29, %v1871_v40  ;;  %v891_v32 = vmul.f32 %v1775_v37, %v887_v28 }
 0x568   :  { %v894_v34 = vmul.f32 %v1775_v37, %v890_v30 }
 0x569   :  { %v1976_v35 = vpop.f32.mrb[4].mxu1  ;;  %905 = vrot.lane.b32.xlu0 %v891_v32, %s1705_s26  ;;  %v892_v41 = vmul.f32 %v1775_v37, %v888_v31  ;;  %v963_v37 = vld [vmem:[%s2110_s1 + $0x100] sm:$0xff] }
 0x56a   :  { %v1979_v38 = vpop.f32.mrb[5].mxu1  ;;  %v1981_v36 = vpack.c.bf16 %v894_v34, %v893_v33 }
 0x56b   :  { %v1983_v39 = vpop.f32.mrb[6].mxu1  ;;  %907 = vrot.lane.b32.xlu1 %v892_v41, %s1705_s26  ;;  %v1985_v40 = vpack.c.bf16 %v892_v41, %v891_v32 }
 0x56c   :  { %v1987_v44 = vpop.f32.mrb[7].mxu1 }
 0x56d   :  { %909 = vrot.lane.b32.xlu0 %v893_v33, %s1705_s26 }
 0x56f   :  { %911 = vrot.lane.b32.xlu1 %v894_v34, %s1705_s26 }
 0x571   :  { %929 = vrot.lane.b32.xlu0 %v891_v32, %s1706_s27 }
 0x573   :  { %931 = vrot.lane.b32.xlu1 %v892_v41, %s1706_s27 }
 0x575   :  { %933 = vrot.lane.b32.xlu0 %v893_v33, %s1706_s27 }
 0x577   :  { %935 = vrot.lane.b32.xlu1 %v894_v34, %s1706_s27 }
 0x579   :  { %989 = vperm.xlu0 %1623, %v963_v37  }
 0x57b   :  { %994 = vperm.xlu1 %1624, %v964_v51  }
 0x57d   :  { %999 = vperm.xlu0 %1623, %v965_v52  }
 0x57f   :  { %1004 = vperm.xlu1 %1624, %v966_v42  }
 0x581   :  { %969 = vperm.xlu0 %1623, %v959_v45  }
 0x583   :  { %974 = vperm.xlu1 %1624, %v960_v46  }
 0x585   :  { %979 = vperm.xlu0 %1623, %v961_v47  }
 0x587   :  { %984 = vperm.xlu1 %1624, %v962_v48  }
 0x589   :  { %383 = vperm.xlu0 %1623, %v355_v49  }
 0x58b   :  { %388 = vperm.xlu1 %1624, %v356_v50  }
 0x58d   :  { %772 = vperm.xlu0 %1623, %v744_v53  }
 0x58f   :  { %777 = vperm.xlu1 %1624, %v745_v54  }
 0x591   :  { %393 = vperm.xlu0 %1623, %v357_v55  }
 0x593   :  { %398 = vperm.xlu1 %1624, %v358_v56  }
 0x595   :  { %782 = vperm.xlu0 %1623, %v746_v57  }
 0x597   :  { %787 = vperm.xlu1 %1624, %v747_v58  }
 0x599   :  { %1140 = vperm.xlu0 %1623, %v1128_v59  }
 0x59b   :  { %1145 = vperm.xlu1 %1624, %v1129_v60  }
 0x59d   :  { %1150 = vperm.xlu0 %1623, %v1130_v61  }
 0x59f   :  { %1155 = vperm.xlu1 %1624, %v1131_v62  }
 0x5a1   :  { %1279 = vperm.xlu0 %1623, %v1276_v63  }
 0x5db   :  { %v906_v1 = vpop.permute.xlu0 %905 }
 0x5dc   :  { %v921_v3 = vmul.f32 %v1408_v0, %v906_v1 }
 0x5dd   :  { %v908_v2 = vpop.permute.xlu1 %907 }
 0x5de   :  { %v922_v4 = vmul.f32 %v1408_v0, %v908_v2 }
 0x5df   :  { %v910_v5 = vpop.permute.xlu0 %909 }
 0x5e0   :  { %v925_v6 = vpack.c.bf16 %v922_v4, %v921_v3  ;;  %v923_v8 = vmul.f32 %v1408_v0, %v910_v5 }
 0x5e1   :  { %v912_v7 = vpop.permute.xlu1 %911 }
 0x5e2   :  { %v924_v9 = vmul.f32 %v1408_v0, %v912_v7  ;;  %1540 = vmatprep.subr.bf16.mxu0 %v925_v6 }
 0x5e3   :  { %1541 = vmatpush3.bf16.msra.mxu0 %v925_v6  ;;  %v930_v12 = vpop.permute.xlu0 %929 }
 0x5e4   :  { %v926_v10 = vpack.c.bf16 %v924_v9, %v923_v8  ;;  %v945_v16 = vmul.f32 %v1409_v13, %v930_v12 }
 0x5e5   :  { %v932_v11 = vpop.permute.xlu1 %931 }
 0x5e6   :  { %1542 = vmatprep.subr.bf16.mxu0 %v926_v10  ;;  %v946_v14 = vmul.f32 %v1409_v13, %v932_v11 }
 0x5e7   :  { %1543 = vmatpush3.bf16.msra.mxu0 %v926_v10  ;;  %v934_v17 = vpop.permute.xlu0 %933 }
 0x5e8   :  { %1544 = vmatprep.subr.bf16.mxu0 %v1985_v40  ;;  %v949_v18 = vpack.c.bf16 %v946_v14, %v945_v16  ;;  %v947_v20 = vmul.f32 %v1409_v13, %v934_v17  ;;  %v1646_v16 = vld [vmem:[%s2113_s2 + $0xa8] sm:$0xff]   ;;  %v1707_v17 = vmov 0.0|0.0  }
 0x5e9   :  { %v936_v15 = vpop.permute.xlu1 %935 }
 0x5ea   :  { %v948_v19 = vmul.f32 %v1409_v13, %v936_v15 }
 0x5eb   :  { %1545 = vmatpush3.bf16.msra.mxu0 %v1985_v40 }
 0x5ec   :  { %1546 = vmatprep.subr.bf16.mxu0 %v1981_v36  ;;  %v950_v21 = vpack.c.bf16 %v948_v19, %v947_v20  ;;  %v1647_v19 = vld [vmem:[%s2113_s2 + $0xb0] sm:$0xff]   ;;  %v1648_v20 = vld [vmem:[%s2113_s2 + $0xb8] sm:$0xff]  }
 0x5ed   :  { %1568 = vmatprep.mubr.msk.bf16.mxu1 %vm421_vm0, %v1647_v19 }
 0x5ef   :  { %1547 = vmatpush3.bf16.msra.mxu0 %v1981_v36 }
 0x5f0   :  { %1548 = vmatprep.subr.bf16.mxu0 %v949_v18 }
 0x5f3   :  { %1549 = vmatpush3.bf16.msra.mxu0 %v949_v18  ;;  %v1709_v18 = vmov 0.0  }
 0x5f4   :  { %1550 = vmatprep.subr.bf16.mxu0 %v950_v21 }
 0x5f7   :  { %1551 = vmatpush3.bf16.msra.mxu0 %v950_v21 }
 0x5f8   :  { %v990_v26 = vpop.permute.xlu0 %989 }
 0x5fa   :  { %1553 = vmatmul.mubr.bf16.vlgmr.msra.gmra.mrb[8].mxu0 %v1642_v22  ;;  %v995_v27 = vpop.permute.xlu1 %994 }
 0x5fb   :  { %1556 = vmatprep.mubr.bf16.mxu0 %v1643_v23 }
 0x5fc   :  { %v1000_v28 = vpop.permute.xlu0 %999 }
 0x5fe   :  { %v1005_v31 = vpop.permute.xlu1 %1004 }
 0x600   :  { %v970_v34 = vpop.permute.xlu0 %969 }
 0x602   :  { %1557 = vmatmul.mubr.bf16.gmra.mrb[12].mxu0 %v1644_v24  ;;  %v975_v41 = vpop.permute.xlu1 %974 }
 0x603   :  { %1564 = vmatprep.mubr.msk.bf16.mxu0 %vm421_vm0, %v1645_v25 }
 0x604   :  { %v980_v46 = vpop.permute.xlu0 %979 }
 0x606   :  { %v985_v53 = vpop.permute.xlu1 %984 }
 0x608   :  { %v384_v21 = vpop.permute.xlu0 %383 }
 0x60a   :  { %v389_v22 = vpop.permute.xlu1 %388 }
 0x60c   :  { %v773_v23 = vpop.permute.xlu0 %772 }
 0x60e   :  { %v778_v24 = vpop.permute.xlu1 %777 }
 0x610   :  { %v394_v25 = vpop.permute.xlu0 %393 }
 0x6cd   :  { %v1554_v29 = vpop.f32.mrb[8].mxu0 }
 0x6ce   :  { %v1065_v30 = vpop.f32.mrb[9].mxu0  ;;  %v1074_v49 = vadd.f32 %v1554_v29, %v980_v46 }
 0x6cf   :  { %v1555_v32 = vpop.f32.mrb[10].mxu0  ;;  %v1066_v54 = vadd.f32 %v1065_v30, %v970_v34  ;;  %v1605_v34 = vadd.f32 %v778_v24, %v389_v22 }
 0x6d0   :  { %v1068_v33 = vpop.f32.mrb[11].mxu0  ;;  %v1077_v56 = vadd.f32 %v1555_v32, %v985_v53  ;;  %v1597_v32 = vadd.f32 %v773_v23, %v384_v21 }
 0x6d1   :  { %v1069_v57 = vadd.f32 %v1068_v33, %v975_v41 }
 0x6d5   :  { %v1558_v36 = vpop.f32.mrb[12].mxu0 }
 0x6d6   :  { %v1090_v40 = vadd.f32 %v1558_v36, %v1000_v28  ;;  %v1081_v37 = vpop.f32.mrb[13].mxu0 }
 0x6d7   :  { %v1082_v43 = vadd.f32 %v1081_v37, %v990_v26  ;;  %v1559_v51 = vpop.f32.mrb[14].mxu0  ;;  %v399_v26 = vpop.permute.xlu1 %398 }
 0x6d8   :  { %v1102_v52 = vmul.f32 0.5, %v1090_v40  ;;  %v1093_v42 = vadd.f32 %v1559_v51, %v1005_v31  ;;  %v1084_v45 = vpop.f32.mrb[15].mxu0  ;;  %v1598_v40 = vadd.f32 %v1597_v32, %v1979_v38 }
 0x6d9   :  { %v1100_v47 = vmul.f32 0.5, %v1082_v43  ;;  %v1085_v48 = vadd.f32 %v1084_v45, %v995_v27  ;;  %v783_v27 = vpop.permute.xlu0 %782 }
 0x6da   :  { %1681 = vtanh.f32 %v1102_v52  ;;  %v1103_v50 = vmul.f32 0.5, %v1093_v42  ;;  %v1593_v31 = vadd.f32 %v783_v27, %v394_v25  ;;  %v1606_v42 = vadd.f32 %v1605_v34, %v1987_v44 }
 0x6db   :  { %1683 = vtanh.f32 %v1100_v47  ;;  %v1101_v55 = vmul.f32 0.5, %v1085_v48  ;;  %v788_v28 = vpop.permute.xlu1 %787 }
 0x6dc   :  { %1685 = vtanh.f32 %v1103_v50  ;;  %v1601_v33 = vadd.f32 %v788_v28, %v399_v26  ;;  %v1594_v36 = vadd.f32 %v1593_v31, %v1976_v35  ;;  %v1699_v35 = vld [vmem:[%s2111_s0 + $0x4] ss:$0 sm:$0xff] }
 0x6dd   :  { %1687 = vtanh.f32 %v1101_v55  ;;  %v1141_v29 = vpop.permute.xlu0 %1140 }
 0x6de   :  { %1689 = vtanh.f32 %v1074_v49  ;;  %v1602_v51 = vadd.f32 %v1601_v33, %v1983_v39  ;;  %v1599_v52 = vadd.f32 %v1598_v40, %v1141_v29 }
 0x6df   :  { %1691 = vtanh.f32 %v1066_v54  ;;  %v1146_v30 = vpop.permute.xlu1 %1145 }
 0x6e0   :  { %1693 = vtanh.f32 %v1077_v56  ;;  %v1607_v49 = vadd.f32 %v1606_v42, %v1146_v30 }
 0x6e1   :  { %1695 = vtanh.f32 %v1069_v57  ;;  %v1151_v41 = vpop.permute.xlu0 %1150 }
 0x6e2   :  { %v1595_v43 = vadd.f32 %v1594_v36, %v1151_v41 }
 0x6e3   :  { %v1156_v37 = vpop.permute.xlu1 %1155 }
 0x6e4   :  { %v1682_v58 = vpop.eup %1681  ;;  %v1603_v46 = vadd.f32 %v1602_v51, %v1156_v37 }
 0x6e5   :  { %v1684_v59 = vpop.eup %1683  ;;  %v1110_v60 = vadd.f32 1.0, %v1682_v58 }
 0x6e6   :  { %v1686_v61 = vpop.eup %1685  ;;  %v1108_v62 = vadd.f32 1.0, %v1684_v59 }
 0x6e7   :  { %v1688_v63 = vpop.eup %1687  ;;  %v1114_v0 = vmul.f32 0.5, %v1110_v60  ;;  %v1111_v1 = vadd.f32 1.0, %v1686_v61  ;;  %v1275_v60 = vld [vmem:[%s2111_s0 + $0x10] sm:$0xf] }
 0x6e8   :  { %v1690_v2 = vpop.eup %1689  ;;  %v1112_v3 = vmul.f32 0.5, %v1108_v62  ;;  %v1109_v4 = vadd.f32 1.0, %v1688_v63 }
 0x6e9   :  { %v1692_v5 = vpop.eup %1691  ;;  %v1118_v6 = vmul.f32 %v1690_v2, %v1114_v0  ;;  %v1115_v7 = vmul.f32 0.5, %v1111_v1  ;;  %v1280_v1 = vpop.permute.xlu0 %1279 }
 0x6ea   :  { %v1694_v8 = vpop.eup %1693  ;;  %v1116_v9 = vmul.f32 %v1692_v5, %v1112_v3  ;;  %v1113_v10 = vmul.f32 0.5, %v1109_v4 }
 0x6eb   :  { %v1696_v11 = vpop.eup %1695  ;;  %v1119_v12 = vmul.f32 %v1694_v8, %v1115_v7 }
 0x6ec   :  { %v1117_v13 = vmul.f32 %v1696_v11, %v1113_v10 }
 0x6ed   :  { %v1137_v14 = vpack.c.bf16 %v1119_v12, %v1118_v6  ;;  %v16_v12 = vld [vmem:[%s2111_s0 + $0x2] sm:$0x3] }
 0x6ee   :  { %v1136_v15 = vpack.c.bf16 %v1117_v13, %v1116_v9 }
 0x6f0   :  { %1560 = vmatprep.subr.bf16.mxu0 %v1136_v15  ;;  %1589 = vmatprep.subr.bf16.mxu1 %v1136_v15 }
 0x6f1   :  { %1561 = vmatpush3.bf16.msra.mxu0 %v1136_v15  ;;  %1591 = vmatpush3.bf16.msra.mxu1 %v1136_v15 }
 0x6f2   :  { %1562 = vmatprep.subr.bf16.mxu0 %v1137_v14  ;;  %1590 = vmatprep.subr.bf16.mxu1 %v1137_v14 }
 0x6f5   :  { %1563 = vmatpush3.bf16.msra.mxu0 %v1137_v14  ;;  %1592 = vmatpush3.bf16.msra.mxu1 %v1137_v14 }
 0x6f6   :  { %1583 = vmatprep.subr.bf16.mxu0 %v1707_v17 }
 0x6f8   :  { %1565 = vmatmul.mubr.msk.bf16.vlgmr.msra.gmra.mrb[16].mxu0 %vm421_vm0, %v1646_v16  ;;  %1569 = vmatmul.mubr.msk.bf16.vlgmr.msra.gmra.mrb[20].mxu1 %vm421_vm0, %v1648_v20 }
 0x6f9   :  { %1580 = vmatprep.mubr.msk.f32.mxu0 %vm1708_vm1, %v1709_v18 }
 0x7cb   :  { %v1566_v45 = vpop.f32.mrb[16].mxu0  ;;  %v1570_v61 = vpop.f32.mrb[20].mxu1 }
 0x7cc   :  { %v1596_v47 = vadd.f32 %v1595_v43, %v1566_v45  ;;  %v1240_v48 = vpop.f32.mrb[17].mxu0  ;;  %v1256_v62 = vpop.f32.mrb[21].mxu1 }
 0x7cd   :  { %v1600_v50 = vadd.f32 %v1599_v52, %v1240_v48  ;;  %v1567_v53 = vpop.f32.mrb[18].mxu0  ;;  %v1571_v63 = vpop.f32.mrb[22].mxu1 }
 0x7ce   :  { %v1604_v54 = vadd.f32 %v1603_v46, %v1567_v53  ;;  %v1243_v55 = vpop.f32.mrb[19].mxu0  ;;  %v1273_v38 = vmul.f32 %v1699_v35, %v1596_v47  ;;  %v1258_v0 = vpop.f32.mrb[23].mxu1 }
 0x7cf   :  { %v1608_v56 = vadd.f32 %v1607_v49, %v1243_v55  ;;  %v1271_v39 = vmul.f32 %v1699_v35, %v1600_v50 }
 0x7d0   :  { %v1274_v57 = vmul.f32 %v1699_v35, %v1604_v54 }
 0x7d1   :  { %v1272_v58 = vmul.f32 %v1699_v35, %v1608_v56 }
 0x7d2   :  { %v1587_v59 = vpack.c.bf16 %v1274_v57, %v1273_v38 }
 0x7d3   :  { %v1584_v44 = vpack.c.bf16 %v1272_v58, %v1271_v39 }
 0x7d5   :  { %1585 = vmatpush3.bf16.msra.mxu0 %v1584_v44 }
 0x7d6   :  { %1586 = vmatprep.subr.bf16.mxu0 %v1707_v17 }
 0x7d9   :  { %1588 = vmatpush3.bf16.msra.mxu0 %v1587_v59 }
 0x7dc   :  { %1581 = vmatmul.mubr.msk.f32.vlgmr.msra.gmra.mrb[20].mxu0 %vm421_vm0, %v1275_v60 }
 0x8af   :  { %v1351_v2 = vpop.f32.mrb[20].mxu0 }
 0x8b0   :  { %v1352_v3 = vadd.f32 %v1351_v2, %v1280_v1  ;;  %v1582_v4 = vpop.f32.mrb[21].mxu0 }
 0x8b2   :  { %v1355_v5 = vmul.f32 1.442695, %v1352_v3  ;;  %v1363_v6 = vmul.f32 %v1699_v35, %v1352_v3  ;;  %v1359_v16 = vrot.slane %v1352_v3, 2 }
 0x8b4   :  { %1697 = vpow2.f32 %v1355_v5  ;;  %v1367_v7 = vsel %vm1366_vm2, %v1363_v6, 0.0 }
 0x8b5   :  { %v1368_v8 = vrot.slane %v1367_v7, 4 }
 0x8b7   :  { %v1369_v9 = vadd.f32 %v1368_v8, %v1367_v7 }
 0x8b9   :  { %v1370_v10 = vrot.slane %v1369_v9, 2 }
 0x8bb   :  { %v1371_v11 = vadd.f32 %v1370_v10, %v1369_v9 }
 0x8bd   :  { %v1372_v13 = vrot.slane %v1371_v11, 1 }
 0x8be   :  { %v1698_v14 = vpop.eup %1697 }
 0x8bf   :  { %v1357_v15 = vmul.f32 %v1698_v14, %v16_v12  ;;  %v1373_v17 = vadd.f32 %v1372_v13, %v1371_v11 }
 0x8c1   :  { %v1361_v18 = vadd.f32 %v1359_v16, %v1357_v15  ;;  %1374 = vst [vmem:[%s2112_s3 + $0x4] sm:$0x1] %v1373_v17 }
 0x8c3   :  { %v1362_v19 = vmul.f32 %v1699_v35, %v1361_v18 }
 0x8c5   :  { %1365 = vst [vmem:[%s2112_s3 + $0x2] sm:$0x3] %v1362_v19 }

</bundles_post_ra>
